<compile_context>
chip_gen: v7x
topology: tpu7x:2x2x1
jax: 0.10.0
libtpu: 0.0.40
codegen_flags: <defaults>
</compile_context>

<pallas_src>
import functools

import jax
import jax.numpy as jnp
from jax.experimental import pallas as pl
from jax.experimental.pallas import tpu as pltpu


def _round_up(n, m):
    return ((n + m - 1) // m) * m


def _pick_chunk(T, max_chunk=32):
    """Largest divisor of T that is <= max_chunk (timesteps per grid step)."""
    tc = min(T, max_chunk)
    while T % tc:
        tc -= 1
    return tc


# --------------------------------------------------------------------------
# Kernel: Tc LSTM-cell steps per grid iteration.
#   Phase A: batched input projection for the whole chunk (one MXU matmul).
#   Phase B: serial recurrence, only h @ Wh on the critical path.
#   Phase C: batched output projection for the whole chunk (one MXU matmul).
# State (h, c) is carried in the constant-index hN/cN output blocks.
# --------------------------------------------------------------------------
def char_rnn_chunk_kernel(x_ref, h0_ref, c0_ref,
                          wx_ref, wh_ref, bg_ref,
                          w2o_ref, b2o_ref,
                          out_ref, hN_ref, cN_ref,
                          pre_scr, hh_scr,
                          *, Tc, Bp, H):
    chunk = pl.program_id(0)

    @pl.when(chunk == 0)
    def _():
        hN_ref[...] = h0_ref[...]
        cN_ref[...] = c0_ref[...]

    # ---- Phase A: pre-gates for all Tc steps in one matmul (M = Tc*Bp) ----
    pre_scr[...] = (jnp.dot(x_ref[...], wx_ref[...],
                            preferred_element_type=jnp.float32)
                    + bg_ref[...])

    wh = wh_ref[...]                                        # resident [H, 4H]
    # Hoisted lane mask (q-gate lanes use tanh, i/f/o lanes use sigmoid).
    q_lane = jax.lax.broadcasted_iota(jnp.int32, (Bp, 4 * H), 1) >= 3 * H

    # ---- Phase B: serial recurrence -------------------------------------
    def step(t, carry):
        h, c = carry
        row = pl.multiple_of(t * Bp, Bp)                    # 8-aligned rows
        gates = pre_scr[pl.ds(row, Bp), :] + jnp.dot(
            h, wh, preferred_element_type=jnp.float32)      # [Bp, 4H]
        act = jnp.where(q_lane, jnp.tanh(gates), jax.nn.sigmoid(gates))
        i_t = act[:, 0 * H:1 * H]
        f_t = act[:, 1 * H:2 * H]
        o_t = act[:, 2 * H:3 * H]
        q_t = act[:, 3 * H:4 * H]
        c = f_t * c + i_t * q_t
        h = o_t * jnp.tanh(c)
        hh_scr[pl.ds(row, Bp), :] = h                       # history for h2o
        return h, c

    h_fin, c_fin = jax.lax.fori_loop(
        0, Tc, step, (hN_ref[...], cN_ref[...]), unroll=True)
    hN_ref[...] = h_fin
    cN_ref[...] = c_fin

    # ---- Phase C: output projection for all Tc steps in one matmul ------
    out = jnp.dot(hh_scr[...], w2o_ref[...],
                  preferred_element_type=jnp.float32) + b2o_ref[...]
    out_ref[...] = out.astype(out_ref.dtype)


# --------------------------------------------------------------------------
# Wrappers
# --------------------------------------------------------------------------
def pack_params(params, input_size):
    """Fuse the four gate Linears into Wx:[I,4H], Wh:[H,4H], bias:[1,4H]."""
    I = input_size
    wx = jnp.concatenate([params["wi"][:I], params["wf"][:I],
                          params["wo"][:I], params["wq"][:I]], axis=1)
    wh = jnp.concatenate([params["wi"][I:], params["wf"][I:],
                          params["wo"][I:], params["wq"][I:]], axis=1)
    bg = jnp.concatenate([params["bi"], params["bf"],
                          params["bo"], params["bq"]], axis=1)
    return wx, wh, bg


def char_rnn_sequence(xs, h0, c0, params, max_chunk=32):
    """Run T LSTM-cell steps in a single pallas_call.

    xs: [T, B, I];  h0, c0: [B, H].
    Returns (outputs [T, B, O], h_T [B, H], c_T [B, H]).
    """
    T, B, I = xs.shape
    H = h0.shape[1]
    O = params["wh2o"].shape[1]
    G = 4 * H

    Bp = max(8, _round_up(B, 8))          # sublane-aligned batch
    Op = _round_up(O, 128)                # lane-dense output stores
    Tc = _pick_chunk(T, max_chunk)        # timesteps per grid iteration
    n_chunks = T // Tc

    wx, wh, bg = pack_params(params, I)
    w2o = jnp.pad(params["wh2o"], ((0, 0), (0, Op - O)))
    b2o = jnp.pad(params["bh2o"], ((0, 0), (0, Op - O)))

    # Flatten time into rows so the kernel's chunk matmuls need no reshape.
    xs_p = jnp.pad(xs, ((0, 0), (0, Bp - B), (0, 0))).reshape(T * Bp, I)
    h0_p = jnp.pad(h0, ((0, Bp - B), (0, 0)))
    c0_p = jnp.pad(c0, ((0, Bp - B), (0, 0)))

    flops = 2 * T * Bp * (I * G + H * G + H * Op)
    transcendentals = T * Bp * (2 * G + H)
    bytes_accessed = 4 * (xs_p.size + h0_p.size + c0_p.size + wx.size
                          + wh.size + bg.size + w2o.size + b2o.size
                          + T * Bp * Op + 2 * Bp * H)

    kernel = functools.partial(char_rnn_chunk_kernel, Tc=Tc, Bp=Bp, H=H)

    outs, hN, cN = pl.pallas_call(
        kernel,
        grid=(n_chunks,),
        in_specs=[
            pl.BlockSpec((Tc * Bp, I), lambda t: (t, 0)),   # x chunk (flat rows)
            pl.BlockSpec((Bp, H), lambda t: (0, 0)),        # h0
            pl.BlockSpec((Bp, H), lambda t: (0, 0)),        # c0
            pl.BlockSpec((I, G), lambda t: (0, 0)),         # Wx   (resident)
            pl.BlockSpec((H, G), lambda t: (0, 0)),         # Wh   (resident)
            pl.BlockSpec((1, G), lambda t: (0, 0)),         # fused gate bias
            pl.BlockSpec((H, Op), lambda t: (0, 0)),        # W h2o (resident)
            pl.BlockSpec((1, Op), lambda t: (0, 0)),        # b h2o
        ],
        out_specs=[
            pl.BlockSpec((Tc * Bp, Op), lambda t: (t, 0)),  # chunk outputs
            pl.BlockSpec((Bp, H), lambda t: (0, 0)),        # carried / final h
            pl.BlockSpec((Bp, H), lambda t: (0, 0)),        # carried / final c
        ],
        out_shape=[
            jax.ShapeDtypeStruct((T * Bp, Op), jnp.float32),
            jax.ShapeDtypeStruct((Bp, H), jnp.float32),
            jax.ShapeDtypeStruct((Bp, H), jnp.float32),
        ],
        scratch_shapes=[
            pltpu.VMEM((Tc * Bp, G), jnp.float32),   # chunk pre-gates
            pltpu.VMEM((Tc * Bp, H), jnp.float32),   # chunk h history
        ],
        compiler_params=pltpu.CompilerParams(
            dimension_semantics=("arbitrary",)),     # time axis carries state
        cost_estimate=pl.CostEstimate(
            flops=flops, transcendentals=transcendentals,
            bytes_accessed=bytes_accessed),
    )(xs_p, h0_p, c0_p, wx, wh, bg, w2o, b2o)

    outs = outs.reshape(T, Bp, Op)
    return outs[:, :B, :O], hN[:B], cN[:B]


def char_rnn_forward(x, h_t, c_t, params):
    """Matches CharRNN.forward exactly: one cell step; returns (output, h_t, c_t)
    with the *input* h_t / c_t passed through unchanged. For real sequences,
    use char_rnn_sequence (amortizes launch/DMA and returns updated state)."""
    outs, _, _ = char_rnn_sequence(x[None], h_t, c_t, params)
    return outs[0], h_t, c_t


def init_params(key, input_size, hidden_size, output_size):
    """Matches weights_init: weight ~ N(0, 0.02), bias = 0.
    Weights stored as [in, out] (already transposed for x @ W)."""
    ks = jax.random.split(key, 5)
    ih = input_size + hidden_size

    def w(k, shape):
        return (0.02 * jax.random.normal(k, shape)).astype(jnp.float32)

    return {
        "wi": w(ks[0], (ih, hidden_size)), "bi": jnp.zeros((1, hidden_size), jnp.float32),
        "wf": w(ks[1], (ih, hidden_size)), "bf": jnp.zeros((1, hidden_size), jnp.float32),
        "wo": w(ks[2], (ih, hidden_size)), "bo": jnp.zeros((1, hidden_size), jnp.float32),
        "wq": w(ks[3], (ih, hidden_size)), "bq": jnp.zeros((1, hidden_size), jnp.float32),
        "wh2o": w(ks[4], (hidden_size, output_size)),
        "bh2o": jnp.zeros((1, output_size), jnp.float32),
    }


def reference_step(x, h, c, p):
    combined = jnp.concatenate([x, h], axis=1)
    i_t = jax.nn.sigmoid(combined @ p["wi"] + p["bi"])
    f_t = jax.nn.sigmoid(combined @ p["wf"] + p["bf"])
    o_t = jax.nn.sigmoid(combined @ p["wo"] + p["bo"])
    q_t = jnp.tanh(combined @ p["wq"] + p["bq"])
    c_n = f_t * c + i_t * q_t
    h_n = o_t * jnp.tanh(c_n)
    return h_n @ p["wh2o"] + p["bh2o"], h_n, c_n


if __name__ == "__main__":
    batch, input_size, hidden_size, output_size, seq_len = 2, 16, 32, 24, 8

    key = jax.random.PRNGKey(0)
    kx, kh, kc, kp, ks = jax.random.split(key, 5)

    x = jax.random.normal(kx, (batch, input_size), dtype=jnp.float32)
    h_t = jax.random.normal(kh, (batch, hidden_size), dtype=jnp.float32)
    c_t = jax.random.normal(kc, (batch, hidden_size), dtype=jnp.float32)
    params = init_params(kp, input_size, hidden_size, output_size)

    # --- single-step call, exactly the PyTorch module semantics ---
    out, h_out, c_out = char_rnn_forward(x, h_t, c_t, params)
    out = jax.block_until_ready(out)
    ref_out, _, _ = reference_step(x, h_t, c_t, params)
    assert out.shape == (batch, output_size)
    assert jnp.allclose(out, ref_out, atol=1e-4, rtol=1e-4)
    assert jnp.array_equal(h_out, h_t) and jnp.array_equal(c_out, c_t)

    # --- T-step sequence: chunked time grid, state carried in output blocks ---
    xs = jax.random.normal(ks, (seq_len, batch, input_size), dtype=jnp.float32)
    outs, h_fin, c_fin = char_rnn_sequence(xs, h_t, c_t, params)
    outs = jax.block_until_ready(outs)

    h_ref, c_ref = h_t, c_t
    ref_outs = []
    for s in range(seq_len):
        o_s, h_ref, c_ref = reference_step(xs[s], h_ref, c_ref, params)
        ref_outs.append(o_s)
    ref_outs = jnp.stack(ref_outs)

    assert outs.shape == (seq_len, batch, output_size)
    assert jnp.allclose(outs, ref_outs, atol=1e-4, rtol=1e-4)
    assert jnp.allclose(h_fin, h_ref, atol=1e-4, rtol=1e-4)
    assert jnp.allclose(c_fin, c_ref, atol=1e-4, rtol=1e-4)

    print("KERNEL_OK")
</pallas_src>

<mosaic_0001>
module attributes {stable_mosaic.version = 11 : i64} {
  func.func @char_rnn_chunk_kernel(%arg0: i32, %arg1: memref<8x16xf32, #tpu.memory_space<vmem>>, %arg2: memref<8x32xf32, #tpu.memory_space<vmem>>, %arg3: memref<8x32xf32, #tpu.memory_space<vmem>>, %arg4: memref<16x128xf32, #tpu.memory_space<vmem>>, %arg5: memref<32x128xf32, #tpu.memory_space<vmem>>, %arg6: memref<1x128xf32, #tpu.memory_space<vmem>>, %arg7: memref<32x128xf32, #tpu.memory_space<vmem>>, %arg8: memref<1x128xf32, #tpu.memory_space<vmem>>, %arg9: memref<8x128xf32, #tpu.memory_space<vmem>>, %arg10: memref<8x32xf32, #tpu.memory_space<vmem>>, %arg11: memref<8x32xf32, #tpu.memory_space<vmem>>, %arg12: memref<8x128xf32, #tpu.memory_space<vmem>>, %arg13: memref<8x32xf32, #tpu.memory_space<vmem>>) attributes {dimension_semantics = [#tpu.dimension_semantics<arbitrary>], iteration_bounds = array<i64: 1>, scalar_prefetch = 0 : i64, scratch_operands = 2 : i64, tpu.core_type = #tpu.core_type<tc>, window_params = [{transform_indices = @transform_0, window_bounds = array<i64: 8, 16>}, {pipeline_mode = #tpu.pipeline_mode<synchronous>, transform_indices = @transform_1, window_bounds = array<i64: 8, 32>}, {pipeline_mode = #tpu.pipeline_mode<synchronous>, transform_indices = @transform_2, window_bounds = array<i64: 8, 32>}, {pipeline_mode = #tpu.pipeline_mode<synchronous>, transform_indices = @transform_3, window_bounds = array<i64: 16, 128>}, {pipeline_mode = #tpu.pipeline_mode<synchronous>, transform_indices = @transform_4, window_bounds = array<i64: 32, 128>}, {pipeline_mode = #tpu.pipeline_mode<synchronous>, transform_indices = @transform_5, window_bounds = array<i64: 1, 128>}, {pipeline_mode = #tpu.pipeline_mode<synchronous>, transform_indices = @transform_6, window_bounds = array<i64: 32, 128>}, {pipeline_mode = #tpu.pipeline_mode<synchronous>, transform_indices = @transform_7, window_bounds = array<i64: 1, 128>}, {transform_indices = @transform_8, window_bounds = array<i64: 8, 128>}, {pipeline_mode = #tpu.pipeline_mode<synchronous>, transform_indices = @transform_9, window_bounds = array<i64: 8, 32>}, {pipeline_mode = #tpu.pipeline_mode<synchronous>, transform_indices = @transform_10, window_bounds = array<i64: 8, 32>}]} {
    %c0_i32 = arith.constant 0 : i32
    %0 = arith.cmpi eq, %arg0, %c0_i32 : i32
    %1 = arith.extui %0 : i1 to i32
    %c0_i32_0 = arith.constant 0 : i32
    %2 = arith.cmpi ne, %1, %c0_i32_0 : i32
    scf.if %2 {
      %c0_32 = arith.constant 0 : index
      %c0_33 = arith.constant 0 : index
      %49 = vector.load %arg2[%c0_32, %c0_33] : memref<8x32xf32, #tpu.memory_space<vmem>>, vector<8x32xf32>
      %c0_34 = arith.constant 0 : index
      %c0_35 = arith.constant 0 : index
      %50 = vector.load %arg10[%c0_34, %c0_35] : memref<8x32xf32, #tpu.memory_space<vmem>>, vector<8x32xf32>
      tpu.vector_store %arg10[%c0_34, %c0_35], %49 {strides = array<i32>} : memref<8x32xf32, #tpu.memory_space<vmem>>, vector<8x32xf32>,
      %c0_36 = arith.constant 0 : index
      %c0_37 = arith.constant 0 : index
      %51 = vector.load %arg3[%c0_36, %c0_37] : memref<8x32xf32, #tpu.memory_space<vmem>>, vector<8x32xf32>
      %c0_38 = arith.constant 0 : index
      %c0_39 = arith.constant 0 : index
      %52 = vector.load %arg11[%c0_38, %c0_39] : memref<8x32xf32, #tpu.memory_space<vmem>>, vector<8x32xf32>
      tpu.vector_store %arg11[%c0_38, %c0_39], %51 {strides = array<i32>} : memref<8x32xf32, #tpu.memory_space<vmem>>, vector<8x32xf32>,
    } else {
    }
    %c0 = arith.constant 0 : index
    %c0_1 = arith.constant 0 : index
    %3 = vector.load %arg1[%c0, %c0_1] : memref<8x16xf32, #tpu.memory_space<vmem>>, vector<8x16xf32>
    %c0_2 = arith.constant 0 : index
    %c0_3 = arith.constant 0 : index
    %4 = vector.load %arg4[%c0_2, %c0_3] : memref<16x128xf32, #tpu.memory_space<vmem>>, vector<16x128xf32>
    %cst = arith.constant dense<0.000000e+00> : vector<8x128xf32>
    %5 = tpu.matmul %3, %4, %cst {dimension_numbers = #tpu.dot_dimension_numbers<[1], [0], [0], [1], [0, 0, 1, 1], [], []>} : vector<8x16xf32>, vector<16x128xf32>, vector<8x128xf32> -> vector<8x128xf32>
    %c0_4 = arith.constant 0 : index
    %c0_5 = arith.constant 0 : index
    %6 = vector.load %arg6[%c0_4, %c0_5] : memref<1x128xf32, #tpu.memory_space<vmem>>, vector<1x128xf32>
    %7 = vector.broadcast %6 : vector<1x128xf32> to vector<8x128xf32>
    %8 = arith.addf %5, %7 : vector<8x128xf32>
    %c0_6 = arith.constant 0 : index
    %c0_7 = arith.constant 0 : index
    %9 = vector.load %arg12[%c0_6, %c0_7] : memref<8x128xf32, #tpu.memory_space<vmem>>, vector<8x128xf32>
    tpu.vector_store %arg12[%c0_6, %c0_7], %8 {strides = array<i32>} : memref<8x128xf32, #tpu.memory_space<vmem>>, vector<8x128xf32>,
    %c0_8 = arith.constant 0 : index
    %c0_9 = arith.constant 0 : index
    %10 = vector.load %arg5[%c0_8, %c0_9] : memref<32x128xf32, #tpu.memory_space<vmem>>, vector<32x128xf32>
    %11 = tpu.iota {dimensions = array<i32: 1>} : vector<8x128xi32>
    %c96_i32 = arith.constant 96 : i32
    %12 = vector.broadcast %c96_i32 : i32 to vector<8x128xi32>
    %13 = arith.cmpi sge, %11, %12 : vector<8x128xi32>
    %c0_10 = arith.constant 0 : index
    %c0_11 = arith.constant 0 : index
    %14 = vector.load %arg10[%c0_10, %c0_11] : memref<8x32xf32, #tpu.memory_space<vmem>>, vector<8x32xf32>
    %c0_12 = arith.constant 0 : index
    %c0_13 = arith.constant 0 : index
    %15 = vector.load %arg11[%c0_12, %c0_13] : memref<8x32xf32, #tpu.memory_space<vmem>>, vector<8x32xf32>
    %c0_i32_14 = arith.constant 0 : i32
    %c8_i32 = arith.constant 8 : i32
    %16 = arith.muli %c0_i32_14, %c8_i32 : i32
    %17 = tpu.assume_multiple %16, 8 : i32
    %18 = arith.index_cast %17 : i32 to index
    %c0_15 = arith.constant 0 : index
    %19 = vector.load %arg12[%18, %c0_15] : memref<8x128xf32, #tpu.memory_space<vmem>>, vector<8x128xf32>
    %cst_16 = arith.constant dense<0.000000e+00> : vector<8x128xf32>
    %20 = tpu.matmul %14, %10, %cst_16 {dimension_numbers = #tpu.dot_dimension_numbers<[1], [0], [0], [1], [0, 0, 1, 1], [], []>} : vector<8x32xf32>, vector<32x128xf32>, vector<8x128xf32> -> vector<8x128xf32>
    %21 = arith.addf %19, %20 : vector<8x128xf32>
    %22 = math.tanh %21 : vector<8x128xf32>
    %23 = arith.negf %21 : vector<8x128xf32>
    %24 = math.exp %23 : vector<8x128xf32>
    %cst_17 = arith.constant 1.000000e+00 : f32
    %25 = vector.broadcast %cst_17 : f32 to vector<8x128xf32>
    %26 = arith.addf %25, %24 : vector<8x128xf32>
    %27 = arith.divf %25, %26 : vector<8x128xf32>
    %28 = arith.select %13, %22, %27 : vector<8x128xi1>, vector<8x128xf32>
    %29 = vector.extract_strided_slice %28 {offsets = [0, 0], sizes = [8, 32], strides = [1, 1]} : vector<8x128xf32> to vector<8x32xf32>
    %30 = vector.extract_strided_slice %28 {offsets = [0, 32], sizes = [8, 32], strides = [1, 1]} : vector<8x128xf32> to vector<8x32xf32>
    %31 = vector.extract_strided_slice %28 {offsets = [0, 64], sizes = [8, 32], strides = [1, 1]} : vector<8x128xf32> to vector<8x32xf32>
    %32 = vector.extract_strided_slice %28 {offsets = [0, 96], sizes = [8, 32], strides = [1, 1]} : vector<8x128xf32> to vector<8x32xf32>
    %33 = arith.mulf %30, %15 : vector<8x32xf32>
    %34 = arith.mulf %29, %32 : vector<8x32xf32>
    %35 = arith.addf %33, %34 : vector<8x32xf32>
    %36 = math.tanh %35 : vector<8x32xf32>
    %37 = arith.mulf %31, %36 : vector<8x32xf32>
    %38 = arith.index_cast %17 : i32 to index
    %c0_18 = arith.constant 0 : index
    %39 = vector.load %arg13[%38, %c0_18] : memref<8x32xf32, #tpu.memory_space<vmem>>, vector<8x32xf32>
    tpu.vector_store %arg13[%38, %c0_18], %37 {strides = array<i32>} : memref<8x32xf32, #tpu.memory_space<vmem>>, vector<8x32xf32>,
    %c1_i32 = arith.constant 1 : i32
    %c0_19 = arith.constant 0 : index
    %c0_20 = arith.constant 0 : index
    %40 = vector.load %arg10[%c0_19, %c0_20] : memref<8x32xf32, #tpu.memory_space<vmem>>, vector<8x32xf32>
    tpu.vector_store %arg10[%c0_19, %c0_20], %37 {strides = array<i32>} : memref<8x32xf32, #tpu.memory_space<vmem>>, vector<8x32xf32>,
    %c0_21 = arith.constant 0 : index
    %c0_22 = arith.constant 0 : index
    %41 = vector.load %arg11[%c0_21, %c0_22] : memref<8x32xf32, #tpu.memory_space<vmem>>, vector<8x32xf32>
    tpu.vector_store %arg11[%c0_21, %c0_22], %35 {strides = array<i32>} : memref<8x32xf32, #tpu.memory_space<vmem>>, vector<8x32xf32>,
    %c0_23 = arith.constant 0 : index
    %c0_24 = arith.constant 0 : index
    %42 = vector.load %arg13[%c0_23, %c0_24] : memref<8x32xf32, #tpu.memory_space<vmem>>, vector<8x32xf32>
    %c0_25 = arith.constant 0 : index
    %c0_26 = arith.constant 0 : index
    %43 = vector.load %arg7[%c0_25, %c0_26] : memref<32x128xf32, #tpu.memory_space<vmem>>, vector<32x128xf32>
    %cst_27 = arith.constant dense<0.000000e+00> : vector<8x128xf32>
    %44 = tpu.matmul %42, %43, %cst_27 {dimension_numbers = #tpu.dot_dimension_numbers<[1], [0], [0], [1], [0, 0, 1, 1], [], []>} : vector<8x32xf32>, vector<32x128xf32>, vector<8x128xf32> -> vector<8x128xf32>
    %c0_28 = arith.constant 0 : index
    %c0_29 = arith.constant 0 : index
    %45 = vector.load %arg8[%c0_28, %c0_29] : memref<1x128xf32, #tpu.memory_space<vmem>>, vector<1x128xf32>
    %46 = vector.broadcast %45 : vector<1x128xf32> to vector<8x128xf32>
    %47 = arith.addf %44, %46 : vector<8x128xf32>
    %c0_30 = arith.constant 0 : index
    %c0_31 = arith.constant 0 : index
    %48 = vector.load %arg9[%c0_30, %c0_31] : memref<8x128xf32, #tpu.memory_space<vmem>>, vector<8x128xf32>
    tpu.vector_store %arg9[%c0_30, %c0_31], %47 {strides = array<i32>} : memref<8x128xf32, #tpu.memory_space<vmem>>, vector<8x128xf32>,
    return
  }
  func.func @transform_0(%arg0: i32) -> (i32, i32) {
    %c0_i32 = arith.constant 0 : i32
    %c0_i32_0 = arith.constant 0 : i32
    return %arg0, %c0_i32 : i32, i32
  }
  func.func @transform_1(%arg0: i32) -> (i32, i32) {
    %c0_i32 = arith.constant 0 : i32
    %c0_i32_0 = arith.constant 0 : i32
    %c0_i32_1 = arith.constant 0 : i32
    return %c0_i32, %c0_i32_0 : i32, i32
  }
  func.func @transform_2(%arg0: i32) -> (i32, i32) {
    %c0_i32 = arith.constant 0 : i32
    %c0_i32_0 = arith.constant 0 : i32
    %c0_i32_1 = arith.constant 0 : i32
    return %c0_i32, %c0_i32_0 : i32, i32
  }
  func.func @transform_3(%arg0: i32) -> (i32, i32) {
    %c0_i32 = arith.constant 0 : i32
    %c0_i32_0 = arith.constant 0 : i32
    %c0_i32_1 = arith.constant 0 : i32
    return %c0_i32, %c0_i32_0 : i32, i32
  }
  func.func @transform_4(%arg0: i32) -> (i32, i32) {
    %c0_i32 = arith.constant 0 : i32
    %c0_i32_0 = arith.constant 0 : i32
    %c0_i32_1 = arith.constant 0 : i32
    return %c0_i32, %c0_i32_0 : i32, i32
  }
  func.func @transform_5(%arg0: i32) -> (i32, i32) {
    %c0_i32 = arith.constant 0 : i32
    %c0_i32_0 = arith.constant 0 : i32
    %c0_i32_1 = arith.constant 0 : i32
    return %c0_i32, %c0_i32_0 : i32, i32
  }
  func.func @transform_6(%arg0: i32) -> (i32, i32) {
    %c0_i32 = arith.constant 0 : i32
    %c0_i32_0 = arith.constant 0 : i32
    %c0_i32_1 = arith.constant 0 : i32
    return %c0_i32, %c0_i32_0 : i32, i32
  }
  func.func @transform_7(%arg0: i32) -> (i32, i32) {
    %c0_i32 = arith.constant 0 : i32
    %c0_i32_0 = arith.constant 0 : i32
    %c0_i32_1 = arith.constant 0 : i32
    return %c0_i32, %c0_i32_0 : i32, i32
  }
  func.func @transform_8(%arg0: i32) -> (i32, i32) {
    %c0_i32 = arith.constant 0 : i32
    %c0_i32_0 = arith.constant 0 : i32
    return %arg0, %c0_i32 : i32, i32
  }
  func.func @transform_9(%arg0: i32) -> (i32, i32) {
    %c0_i32 = arith.constant 0 : i32
    %c0_i32_0 = arith.constant 0 : i32
    %c0_i32_1 = arith.constant 0 : i32
    return %c0_i32, %c0_i32_0 : i32, i32
  }
  func.func @transform_10(%arg0: i32) -> (i32, i32) {
    %c0_i32 = arith.constant 0 : i32
    %c0_i32_0 = arith.constant 0 : i32
    %c0_i32_1 = arith.constant 0 : i32
    return %c0_i32, %c0_i32_0 : i32, i32
  }
}

</mosaic_0001>

<bundles_post_ra>
// kernel: tpu_custom_call.1
= control target key start
LH: loop header
LB: loop body
LE: loop exit
PB: predicated region body
PF: predicated region fallthrough
CT: control target
= control target key end

     0   :  { %16 = vsyncpa [#allocation5], 0  ;;  %s985_s0 = inlined_call_operand.hbm [shape: f32[8,16], index: 0, kind: input, shape index: {}]   ;;  %s986_s1 = inlined_call_operand.hbm [shape: f32[8,32], index: 1, kind: input, shape index: {}]   ;;  %s987_s2 = inlined_call_operand.hbm [shape: f32[8,32], index: 2, kind: input, shape index: {}]   ;;  %s988_s3 = inlined_call_operand.hbm [shape: f32[16,128], index: 3, kind: input, shape index: {}]   ;;  %s989_s4 = inlined_call_operand.hbm [shape: f32[32,128], index: 4, kind: input, shape index: {}]   ;;  %s990_s5 = inlined_call_operand.vmem [shape: f32[1,128], index: 5, kind: input, shape index: {}]   ;;  %s991_s6 = inlined_call_operand.hbm [shape: f32[32,128], index: 6, kind: input, shape index: {}]   ;;  %s992_s7 = inlined_call_operand.vmem [shape: f32[1,128], index: 7, kind: input, shape index: {}]   ;;  %s993_s8 = inlined_call_operand.hbm [shape: f32[8,128], index: 8, kind: output, shape index: {0}]   ;;  %s994_s9 = inlined_call_operand.hbm [shape: f32[8,32], index: 9, kind: output, shape index: {1}]   ;;  %s995_s10 = inlined_call_operand.hbm [shape: f32[8,32], index: 10, kind: output, shape index: {2}]  }
   0x1   :  { %17 = vsyncpa [#allocation8], 0 }
   0x2   :  { %18 = vsyncpa [#allocation11], 0 }
   0x3   :  { %19 = vsyncpa [#allocation14], 0 }
   0x4   :  { %20 = vsyncpa [#allocation6], 0 }
   0x5   :  { %21 = vsyncpa [#allocation17], 0  ;;  %s761_s13 = smov [#allocation7]   ;;  %s762_s15 = smov [#allocation10]  }
   0x6   :  { %s38_s14 = sshll.u32 %s761_s13, 4  ;;  %s57_s16 = sshll.u32 %s762_s15, 4  ;;  %s39_s14 = int_to_ptr.vmem [resolvable:$true] %s38_s14  ;;  %s833_s16 = int_to_ptr.vmem [resolvable:$true] %s57_s16 }
   0x7   :  { %s551_s19 = scalar_lea.hbm %s986_s1, 128 }
   0x8   :  { %p552_p0 = scmp.ne.s32.totalorder %s986_s1, %s551_s19  ;;  %p555_p1 = scmp.lt.u32.totalorder %s551_s19, %s986_s1 }
   0xa   :  { %p557_p2 = pnand %p555_p1, %p552_p0 }
   0xc   :  { %560 = shalt.err (!%p557_p2)
}
   0xd   :  { %s561_s24 = scalar_lea.vmem %s39_s14, 128  ;;  %p566_p4 = scmp.lt.s32.totalorder %s39_s14, %s39_s14 }
   0xe   :  { %p562_p3 = scmp.ne.s32.totalorder %s39_s14, %s561_s24  ;;  %p567_p5 = scmp.lt.s32.totalorder %s561_s24, %s561_s24 }
  0x10   :  { %p568_p6 = por %p567_p5, %p566_p4 }
  0x12   :  { %p569_p7 = pnand %p568_p6, %p562_p3 }
  0x14   :  { %572 = shalt.err (!%p569_p7)
}
  0x15   :  { %41 = dma.hbm_to_vmem [thread:$0]  %s986_s1, 128, %s39_s14, [#allocation8]  }
  0x16   :  { %s573_s29 = scalar_lea.hbm %s988_s3, 256 }
  0x17   :  { %p574_p8 = scmp.ne.s32.totalorder %s988_s3, %s573_s29  ;;  %p577_p9 = scmp.lt.u32.totalorder %s573_s29, %s988_s3 }
  0x19   :  { %p579_p10 = pnand %p577_p9, %p574_p8 }
  0x1b   :  { %582 = shalt.err (!%p579_p10)
}
  0x1c   :  { %s583_s15 = scalar_lea.vmem %s833_s16, 256  ;;  %p588_p12 = scmp.lt.s32.totalorder %s833_s16, %s833_s16 }
  0x1d   :  { %p584_p11 = scmp.ne.s32.totalorder %s833_s16, %s583_s15  ;;  %p589_p13 = scmp.lt.s32.totalorder %s583_s15, %s583_s15 }
  0x1f   :  { %p590_p0 = por %p589_p13, %p588_p12 }
  0x21   :  { %p591_p1 = pnand %p590_p0, %p584_p11 }
  0x23   :  { %594 = shalt.err (!%p591_p1)
}
  0x24   :  { %s763_s1 = smov 128   ;;  %s764_s14 = smov 8  }
  0x25   :  { %63 = dma.hbm_to_vmem [thread:$0]  %s988_s3, 256, %s833_s16, [#allocation11], %s763_s1, %s763_s1, %s764_s14  }
  0x26   :  { %s765_s19 = smov [#allocation4]   ;;  %s766_s21 = smov [#allocation9]  }
  0x27   :  { %s28_s20 = sshll.u32 %s765_s19, 4  ;;  %s48_s22 = sshll.u32 %s766_s21, 4  ;;  %s29_s20 = int_to_ptr.vmem [resolvable:$true] %s28_s20  ;;  %s49_s22 = int_to_ptr.vmem [resolvable:$true] %s48_s22 }
  0x28   :  { %s595_s25 = scalar_lea.hbm %s985_s0, 128 }
  0x29   :  { %p596_p2 = scmp.ne.s32.totalorder %s985_s0, %s595_s25  ;;  %p599_p3 = scmp.lt.u32.totalorder %s595_s25, %s985_s0 }
  0x2b   :  { %p601_p4 = pnand %p599_p3, %p596_p2 }
  0x2d   :  { %604 = shalt.err (!%p601_p4)
}
  0x2e   :  { %s605_s3 = scalar_lea.vmem %s29_s20, 128  ;;  %p610_p6 = scmp.lt.s32.totalorder %s29_s20, %s29_s20 }
  0x2f   :  { %p606_p5 = scmp.ne.s32.totalorder %s29_s20, %s605_s3  ;;  %p611_p7 = scmp.lt.s32.totalorder %s605_s3, %s605_s3 }
  0x31   :  { %p612_p8 = por %p611_p7, %p610_p6 }
  0x33   :  { %p613_p9 = pnand %p612_p8, %p606_p5 }
  0x35   :  { %616 = shalt.err (!%p613_p9)
}
  0x36   :  { %31 = dma.hbm_to_vmem [thread:$0]  %s985_s0, 128, %s29_s20, [#allocation5]  }
  0x37   :  { %s617_s13 = scalar_lea.hbm %s987_s2, 128 }
  0x38   :  { %p618_p10 = scmp.ne.s32.totalorder %s987_s2, %s617_s13  ;;  %p621_p11 = scmp.lt.u32.totalorder %s617_s13, %s987_s2 }
  0x3a   :  { %p623_p12 = pnand %p621_p11, %p618_p10 }
  0x3c   :  { %626 = shalt.err (!%p623_p12)
}
  0x3d   :  { %s627_s21 = scalar_lea.vmem %s49_s22, 128  ;;  %p632_p0 = scmp.lt.s32.totalorder %s49_s22, %s49_s22 }
  0x3e   :  { %p628_p13 = scmp.ne.s32.totalorder %s49_s22, %s627_s21  ;;  %p633_p1 = scmp.lt.s32.totalorder %s627_s21, %s627_s21 }
  0x40   :  { %p634_p2 = por %p633_p1, %p632_p0 }
  0x42   :  { %p635_p3 = pnand %p634_p2, %p628_p13 }
  0x44   :  { %638 = shalt.err (!%p635_p3)
}
  0x45   :  { %51 = dma.hbm_to_vmem [thread:$0]  %s987_s2, 128, %s49_s22, [#allocation8]  }
  0x46   :  { %s767_s23 = smov [#allocation12]   ;;  %s768_s25 = smov [#allocation13]  }
  0x47   :  { %s69_s24 = sshll.u32 %s767_s23, 4  ;;  %s83_s26 = sshll.u32 %s768_s25, 4  ;;  %s70_s24 = int_to_ptr.vmem [resolvable:$true] %s69_s24  ;;  %s891_s26 = int_to_ptr.vmem [resolvable:$true] %s83_s26 }
  0x48   :  { %s639_s29 = scalar_lea.hbm %s989_s4, 512 }
  0x49   :  { %p640_p4 = scmp.ne.s32.totalorder %s989_s4, %s639_s29  ;;  %p643_p5 = scmp.lt.u32.totalorder %s639_s29, %s989_s4 }
  0x4b   :  { %p645_p6 = pnand %p643_p5, %p640_p4 }
  0x4d   :  { %648 = shalt.err (!%p645_p6)
}
  0x4e   :  { %s649_s2 = scalar_lea.vmem %s70_s24, 512  ;;  %p654_p8 = scmp.lt.s32.totalorder %s70_s24, %s70_s24 }
  0x4f   :  { %p650_p7 = scmp.ne.s32.totalorder %s70_s24, %s649_s2  ;;  %p655_p9 = scmp.lt.s32.totalorder %s649_s2, %s649_s2 }
  0x51   :  { %p656_p10 = por %p655_p9, %p654_p8 }
  0x53   :  { %p657_p11 = pnand %p656_p10, %p650_p7 }
  0x55   :  { %660 = shalt.err (!%p657_p11)
}
  0x56   :  { %75 = dma.hbm_to_vmem [thread:$0]  %s989_s4, 512, %s70_s24, [#allocation11], %s763_s1, %s763_s1, %s764_s14  }
  0x57   :  { %s661_s17 = scalar_lea.hbm %s991_s6, 512 }
  0x58   :  { %p662_p12 = scmp.ne.s32.totalorder %s991_s6, %s661_s17  ;;  %p665_p13 = scmp.lt.u32.totalorder %s661_s17, %s991_s6 }
  0x5a   :  { %p667_p0 = pnand %p665_p13, %p662_p12 }
  0x5c   :  { %670 = shalt.err (!%p667_p0)
}
  0x5d   :  { %s671_s20 = scalar_lea.vmem %s891_s26, 512  ;;  %p676_p2 = scmp.lt.s32.totalorder %s891_s26, %s891_s26 }
  0x5e   :  { %p672_p1 = scmp.ne.s32.totalorder %s891_s26, %s671_s20  ;;  %p677_p3 = scmp.lt.s32.totalorder %s671_s20, %s671_s20 }
  0x60   :  { %p678_p4 = por %p677_p3, %p676_p2 }
  0x62   :  { %p679_p5 = pnand %p678_p4, %p672_p1 }
  0x64   :  { %682 = shalt.err (!%p679_p5)
}
  0x65   :  { %89 = dma.hbm_to_vmem [thread:$0]  %s991_s6, 512, %s891_s26, [#allocation14], %s763_s1, %s763_s1, %s764_s14  }
  0x66   :  { %749 = dma.done.wait [#allocation5], 128  }
  0x67   :  { %750 = vsyncadd [#allocation5], 4294967168 }
  0x68   :  { %751 = dma.done.wait [#allocation8], 256  }
  0x69   :  { %752 = vsyncadd [#allocation8], 4294967040 }
  0x6a   :  { %753 = dma.done.wait [#allocation11], 768  }
  0x6b   :  { %754 = vsyncadd [#allocation11], 4294966528 }
  0x6c   :  { %755 = dma.done.wait [#allocation14], 512  }
  0x6d   :  { %756 = vsyncadd [#allocation14], 4294966784  ;;  %v769_v0 = vmov 0.0|0.0   ;;  %vm770_vm0 = vmmov 0   ;;  %v771_v1 = vmov 0.0   ;;  %v120_v2 = vld [vmem:[#allocation10] sm:$0xff]  ;;  %v208_v22 = vlaneseq }
  0x6e   :  { %508 = vmatprep.subr.bf16.mxu0 %v769_v0  ;;  %483 = vmatprep.mubr.msk.f32.mxu0 %vm770_vm0, %v771_v1  ;;  %v121_v3 = vld [vmem:[#allocation10 + $0x8] sm:$0xff]  ;;  %vm115_vm1 = vcmask 261120   ;;  %v204_v5 = vld [vmem:[#allocation12] sm:$0xff]  ;;  %v205_v6 = vld [vmem:[#allocation12 + $0x8] sm:$0xff]  ;;  %vm129_vm2 = vcmask 130048   ;;  %s772_s14 = smov 32  }
  0x6f   :  { %517 = vmatprep.subr.bf16.mxu1 %v769_v0  ;;  %505 = vmatprep.mubr.msk.f32.mxu1 %vm770_vm0, %v771_v1  ;;  %v509_v4 = vpack.c.bf16 %v121_v3, %v120_v2  ;;  %v114_v7 = vld [vmem:[#allocation7] sm:$0xff]  ;;  %v117_v8 = vld [vmem:[#allocation9] sm:$0xff]  ;;  %v119_v9 = vld [vmem:[#allocation4] sm:$0xff]  ;;  %v512_v10 = vpack.c.bf16 %v205_v6, %v204_v5  ;;  %v209_v23 = vand.u32 127, %v208_v22  ;;  %s774_s24 = smov 64   ;;  %s775_s25 = smov [#allocation16]  }
  0x70   :  { %116 = vst.msk [vmem:[#allocation16] sm:$0xff] %vm115_vm1, %v114_v7  ;;  %118 = vst.msk [vmem:[#allocation18] sm:$0xff] %vm115_vm1, %v117_v8  ;;  %v206_v11 = vld [vmem:[#allocation12 + $0x10] sm:$0xff]  ;;  %v207_v12 = vld [vmem:[#allocation12 + $0x18] sm:$0xff]  ;;  %s431_s26 = sshll.u32 %s775_s25, 4  ;;  %s432_s26 = int_to_ptr.vmem [resolvable:$true] %s431_s26 }
  0x71   :  { %510 = vmatpush3.bf16.msra.mxu0 %v509_v4  ;;  %v515_v13 = vpack.c.bf16 %v207_v12, %v206_v11  ;;  %v460_v15 = vld [vmem:[%s990_s5] ss:$0 sm:$0xff]  ;;  %vm210_vm3 = vcmp.ge.s32.totalorder %v209_v23, 96  ;;  %s773_s5 = smov 96   ;;  %v330_v35 = vld [vmem:[#allocation13] sm:$0xff]  ;;  %v331_v36 = vld [vmem:[#allocation13 + $0x8] sm:$0xff]  ;;  %p688_p7 = scmp.lt.s32.totalorder %s432_s26, %s432_s26 }
  0x72   :  { %511 = vmatprep.subr.bf16.mxu0 %v769_v0  ;;  %v518_v37 = vpack.c.bf16 %v331_v36, %v330_v35  ;;  %v332_v38 = vld [vmem:[#allocation13 + $0x10] sm:$0xff]  ;;  %v333_v39 = vld [vmem:[#allocation13 + $0x18] sm:$0xff]  ;;  %s683_s27 = scalar_lea.vmem %s432_s26, 128 }
  0x73   :  { %v521_v40 = vpack.c.bf16 %v333_v39, %v332_v38  ;;  %p684_p6 = scmp.ne.s32.totalorder %s432_s26, %s683_s27  ;;  %p689_p8 = scmp.lt.s32.totalorder %s683_s27, %s683_s27 }
  0x74   :  { %484 = vmatmul.mubr.msk.f32.vlgmr.msra.gmra.mrb[0].mxu0 %vm129_vm2, %v119_v9  ;;  %519 = vmatpush3.bf16.msra.mxu1 %v518_v37 }
  0x75   :  { %513 = vmatpush3.bf16.msra.mxu0 %v512_v10  ;;  %494 = vmatprep.mubr.msk.f32.mxu0 %vm770_vm0, %v771_v1  ;;  %p690_p9 = por %p689_p8, %p688_p7 }
  0x76   :  { %514 = vmatprep.subr.bf16.mxu0 %v769_v0  ;;  %520 = vmatprep.subr.bf16.mxu1 %v769_v0 }
  0x77   :  { %v211_v14 = vld [vmem:[#allocation16] sm:$0xff]  ;;  %v212_v27 = vld [vmem:[#allocation18] sm:$0xff]  ;;  %p691_p10 = pnand %p690_p9, %p684_p6 }
  0x78   :  { %522 = vmatpush3.bf16.msra.mxu1 %v521_v40 }
  0x79   :  { %516 = vmatpush3.bf16.msra.mxu0 %v515_v13 }
  0x7c   :  { %495 = vmatmul.mubr.msk.f32.vlgmr.msra.gmra.mrb[0].mxu0 %vm115_vm1, %v211_v14 }
 0x14f   :  { %v284_v16 = vpop.f32.mrb[0].mxu0 }
 0x150   :  { %v523_v17 = vadd.f32 %v460_v15, %v284_v16  ;;  %v496_v18 = vpop.f32.mrb[1].mxu0 }
 0x152   :  { %v463_v19 = vmul.f32 -1.442695, %v523_v17 }
 0x154   :  { %543 = vpow2.f32 %v463_v19 }
 0x155   :  { %545 = vtanh.f32 %v523_v17 }
 0x15e   :  { %v544_v20 = vpop.eup %543 }
 0x15f   :  { %v293_v21 = vadd.f32 1.0, %v544_v20  ;;  %v546_v24 = vpop.eup %545 }
 0x161   :  { %547 = vrcp.f32 %v293_v21 }
 0x16b   :  { %v548_v25 = vpop.eup %547 }
 0x16c   :  { %v296_v26 = vsel %vm210_vm3, %v546_v24, %v548_v25 }
 0x16d   :  { %303 = vrot.lane.b32.xlu0 %v296_v26, %s772_s14 }
 0x171   :  { %298 = vrot.lane.b32.xlu0 %v212_v27, %s772_s14 }
 0x1df   :  { %v304_v28 = vpop.permute.xlu0 %303 }
 0x1e0   :  { %v306_v29 = vmul.f32 %v304_v28, %v296_v26 }
 0x1e2   :  { %308 = vrot.lane.b32.xlu1 %v306_v29, %s772_s14 }
 0x1e3   :  { %v299_v30 = vpop.permute.xlu0 %298 }
 0x1e4   :  { %v301_v31 = vmul.f32 %v299_v30, %v296_v26 }
 0x254   :  { %v309_v32 = vpop.permute.xlu1 %308 }
 0x255   :  { %v311_v33 = vadd.f32 %v309_v32, %v301_v31 }
 0x257   :  { %549 = vtanh.f32 %v311_v33 }
 0x261   :  { %v550_v34 = vpop.eup %549 }
 0x262   :  { %314 = vrot.lane.b32.xlu1 %v550_v34, %s772_s14 }
 0x266   :  { %325 = vrot.lane.b32.xlu1 %v311_v33, %s773_s5 }
 0x2d4   :  { %v315_v41 = vpop.permute.xlu1 %314 }
 0x2d5   :  { %v317_v42 = vmul.f32 %v315_v41, %v296_v26 }
 0x2d7   :  { %319 = vrot.lane.b32.xlu0 %v317_v42, %s774_s24 }
 0x2d8   :  { %v326_v43 = vpop.permute.xlu1 %325 }
 0x2d9   :  { %328 = vst.msk [vmem:[#allocation18] sm:$0xff] %vm115_vm1, %v326_v43 }
 0x349   :  { %v320_v44 = vpop.permute.xlu0 %319 }
 0x34a   :  { %322 = vst.msk [vmem:[#allocation3] sm:$0xff] %vm115_vm1, %v320_v44  ;;  %323 = vst.msk [vmem:[#allocation16] sm:$0xff] %vm115_vm1, %v320_v44 }
 0x351   :  { %v329_v45 = vld [vmem:[#allocation3] sm:$0xff] }
 0x352   :  { %506 = vmatmul.mubr.msk.f32.vlgmr.msra.gmra.mrb[0].mxu1 %vm115_vm1, %v329_v45 }
 0x353   :  { %694 = shalt.err (!%p691_p10)
}
 0x354   :  { %s695_s3 = scalar_lea.hbm %s994_s9, 128 }
 0x355   :  { %p696_p11 = scmp.ne.s32.totalorder %s994_s9, %s695_s3  ;;  %p699_p12 = scmp.lt.u32.totalorder %s695_s3, %s994_s9 }
 0x357   :  { %p701_p13 = pnand %p699_p12, %p696_p11 }
 0x359   :  { %704 = shalt.err (!%p701_p13)
}
 0x35a   :  { %434 = dma.vmem_to_hbm [thread:$0]  %s432_s26, 128, %s994_s9, [#allocation17]  }
 0x35b   :  { %s776_s13 = smov [#allocation18]  }
 0x35c   :  { %s441_s15 = sshll.u32 %s776_s13, 4  ;;  %s442_s15 = int_to_ptr.vmem [resolvable:$true] %s441_s15 }
 0x35d   :  { %s705_s17 = scalar_lea.vmem %s442_s15, 128  ;;  %p710_p1 = scmp.lt.s32.totalorder %s442_s15, %s442_s15 }
 0x35e   :  { %p706_p0 = scmp.ne.s32.totalorder %s442_s15, %s705_s17  ;;  %p711_p2 = scmp.lt.s32.totalorder %s705_s17, %s705_s17 }
 0x360   :  { %p712_p3 = por %p711_p2, %p710_p1 }
 0x362   :  { %p713_p4 = pnand %p712_p3, %p706_p0 }
 0x364   :  { %716 = shalt.err (!%p713_p4)
}
 0x365   :  { %s717_s21 = scalar_lea.hbm %s995_s10, 128 }
 0x366   :  { %p718_p5 = scmp.ne.s32.totalorder %s995_s10, %s717_s21  ;;  %p721_p6 = scmp.lt.u32.totalorder %s717_s21, %s995_s10 }
 0x368   :  { %p723_p7 = pnand %p721_p6, %p718_p5 }
 0x36a   :  { %726 = shalt.err (!%p723_p7)
}
 0x36b   :  { %444 = dma.vmem_to_hbm [thread:$0]  %s442_s15, 128, %s995_s10, [#allocation17]   ;;  %v464_v46 = vld [vmem:[%s992_s7] ss:$0 sm:$0xff] }
 0x36c   :  { %s777_s5 = smov [#allocation15]  }
 0x36d   :  { %s421_s24 = sshll.u32 %s777_s5, 4  ;;  %s422_s24 = int_to_ptr.vmem [resolvable:$true] %s421_s24 }
 0x36e   :  { %s727_s25 = scalar_lea.vmem %s422_s24, 128  ;;  %p732_p9 = scmp.lt.s32.totalorder %s422_s24, %s422_s24 }
 0x36f   :  { %p728_p8 = scmp.ne.s32.totalorder %s422_s24, %s727_s25  ;;  %p733_p10 = scmp.lt.s32.totalorder %s727_s25, %s727_s25 }
 0x371   :  { %p734_p11 = por %p733_p10, %p732_p9 }
 0x373   :  { %p735_p12 = pnand %p734_p11, %p728_p8 }
 0x425   :  { %v410_v47 = vpop.f32.mrb[0].mxu1 }
 0x426   :  { %v411_v48 = vadd.f32 %v464_v46, %v410_v47  ;;  %v507_v49 = vpop.f32.mrb[1].mxu1 }
 0x428   :  { %414 = vst [vmem:[#allocation15] sm:$0xff] %v411_v48 }
 0x429   :  { %738 = shalt.err (!%p735_p12)
}
 0x42a   :  { %s739_s27 = scalar_lea.hbm %s993_s8, 128 }
 0x42b   :  { %p740_p13 = scmp.ne.s32.totalorder %s993_s8, %s739_s27  ;;  %p743_p0 = scmp.lt.u32.totalorder %s739_s27, %s993_s8 }
 0x42d   :  { %p745_p1 = pnand %p743_p0, %p740_p13 }
 0x42f   :  { %748 = shalt.err (!%p745_p1)
}
 0x430   :  { %424 = dma.vmem_to_hbm [thread:$0]  %s422_s24, 128, %s993_s8, [#allocation6]  }
 0x431   :  { %757 = dma.done.wait [#allocation6], 128  }
 0x432   :  { %758 = vsyncadd [#allocation6], 4294967168 }
 0x433   :  { %759 = dma.done.wait [#allocation17], 256  }
 0x434   :  { %760 = vsyncadd [#allocation17], 4294967040 }
 0x435   :  { %454 = vsyncpa [#allocation5], 1 }
 0x436   :  { %455 = vsyncpa [#allocation8], 1 }
 0x437   :  { %456 = vsyncpa [#allocation11], 1 }
 0x438   :  { %457 = vsyncpa [#allocation14], 1 }
 0x439   :  { %458 = vsyncpa [#allocation6], 1 }
 0x43a   :  { %459 = vsyncpa [#allocation17], 1 }

</bundles_post_ra>
